<compile_context>
chip_gen: v7x
topology: tpu7x:2x2x1
jax: 0.10.0
libtpu: 0.0.40
codegen_flags: <defaults>
</compile_context>

<pallas_src>
import jax
import jax.numpy as jnp
from jax.experimental import pallas as pl
from jax.experimental.pallas import tpu as pltpu


def _make_kernels(act_dtype):
    """Build kernel bodies; `act_dtype` is the dtype the tanh EUP ops run in."""

    def _mlp_body(x_ref, w1_ref, b1_ref, w2_ref, b2_ref, w3_ref, b3_ref):
        # In-kernel bf16 cast of x (cheap VALU work hidden under the input DMA);
        # avoids a separate wrapper-side convert pass over HBM.
        x = x_ref[...].astype(w1_ref.dtype)
        z1 = jnp.dot(x, w1_ref[...], preferred_element_type=jnp.float32) + b1_ref[...]
        h1 = jnp.tanh(z1.astype(act_dtype))
        z2 = jnp.dot(h1.astype(w2_ref.dtype), w2_ref[...],
                     preferred_element_type=jnp.float32) + b2_ref[...]
        h2 = jnp.tanh(z2.astype(act_dtype))
        y = jnp.dot(h2.astype(w3_ref.dtype), w3_ref[...],
                    preferred_element_type=jnp.float32) + b3_ref[...]
        return y, h2

    def kernel_y_and_h(x_ref, w1_ref, b1_ref, w2_ref, b2_ref, w3_ref, b3_ref,
                       y_ref, h_ref):
        y, h2 = _mlp_body(x_ref, w1_ref, b1_ref, w2_ref, b2_ref, w3_ref, b3_ref)
        y_ref[...] = y.astype(y_ref.dtype)
        h_ref[...] = h2.astype(h_ref.dtype)

    def kernel_y_only(x_ref, w1_ref, b1_ref, w2_ref, b2_ref, w3_ref, b3_ref, y_ref):
        y, _ = _mlp_body(x_ref, w1_ref, b1_ref, w2_ref, b2_ref, w3_ref, b3_ref)
        y_ref[...] = y.astype(y_ref.dtype)

    return kernel_y_and_h, kernel_y_only


def _round_up(n, m):
    return ((n + m - 1) // m) * m


def _default_bf16_tanh():
    """bf16 EUP exists on v6e/v7x; v5e (and earlier) has no bf16 VPU/EUP."""
    try:
        kind = jax.devices()[0].device_kind.lower()
    except Exception:
        return False
    return not any(g in kind for g in ("v2", "v3", "v4", "v5"))


def early_fusion(x, params, hid_feature=False, *,
                 tile_batch=8192,
                 weight_dtype=jnp.bfloat16,
                 out_dtype=jnp.bfloat16,
                 bf16_tanh=None):
    """EarlyFusion forward. x: [B, in_features]. params: dict w1,b1,w2,b2,w3,b3."""
    if bf16_tanh is None:
        bf16_tanh = _default_bf16_tanh()
    act_dtype = jnp.bfloat16 if bf16_tanh else jnp.float32

    # Weights are tiny: casting them in the wrapper is negligible. x is NOT cast here
    # (that would be an extra full HBM pass); the kernel casts it before the fc1 dot.
    w1 = params["w1"].astype(weight_dtype)
    w2 = params["w2"].astype(weight_dtype)
    w3 = params["w3"].astype(weight_dtype)
    b1 = params["b1"].astype(jnp.float32)
    b2 = params["b2"].astype(jnp.float32)
    b3 = params["b3"].astype(jnp.float32)

    B, in_f = x.shape
    hid = w2.shape[1]
    nc = w3.shape[1]

    # Batch row tile:
    #  * large (default 8192) to amortize the ~0.35us/step grid overhead,
    #  * multiple of 16 so bf16 operands fill packed vregs,
    #  * ~ceil(B/2) when B is small-ish so the "parallel" axis has >=2 steps and both
    #    v7x TensorCores get work,
    #  * never larger than round_up(B, 8) (keeps the single-block case tight).
    tb = min(tile_batch, max(16, _round_up(-(-B // 2), 16)))
    tb = min(tb, _round_up(B, 8))
    grid = (pl.cdiv(B, tb),)

    def row_spec(f):
        return pl.BlockSpec((tb, f), lambda i: (i, 0))

    def resident(a):
        # Full-extent block with a grid-invariant index -> stays VMEM-resident.
        return pl.BlockSpec(a.shape, lambda i: (0,) * a.ndim)

    in_specs = [row_spec(in_f), resident(w1), resident(b1),
                resident(w2), resident(b2), resident(w3), resident(b3)]

    compiler_params = pltpu.CompilerParams(
        dimension_semantics=("parallel",),
        vmem_limit_bytes=64 * 1024 * 1024,
    )

    out_itemsize = jnp.dtype(out_dtype).itemsize
    w_bytes = sum(int(a.size) * a.dtype.itemsize for a in (w1, b1, w2, b2, w3, b3))
    flops = 2 * B * (in_f * hid + hid * hid + hid * nc)
    transcendentals = 2 * B * hid
    bytes_accessed = (int(x.size) * x.dtype.itemsize + w_bytes
                      + B * nc * out_itemsize
                      + (B * hid * out_itemsize if hid_feature else 0))
    cost = pl.CostEstimate(flops=flops, transcendentals=transcendentals,
                           bytes_accessed=bytes_accessed)

    kernel_y_and_h, kernel_y_only = _make_kernels(act_dtype)

    if hid_feature:
        y, h = pl.pallas_call(
            kernel_y_and_h,
            grid=grid,
            out_shape=(
                jax.ShapeDtypeStruct((B, nc), out_dtype),
                jax.ShapeDtypeStruct((B, hid), out_dtype),
            ),
            in_specs=in_specs,
            out_specs=(row_spec(nc), row_spec(hid)),
            compiler_params=compiler_params,
            cost_estimate=cost,
        )(x, w1, b1, w2, b2, w3, b3)
        return y, h

    y = pl.pallas_call(
        kernel_y_only,
        grid=grid,
        out_shape=jax.ShapeDtypeStruct((B, nc), out_dtype),
        in_specs=in_specs,
        out_specs=row_spec(nc),
        compiler_params=compiler_params,
        cost_estimate=cost,
    )(x, w1, b1, w2, b2, w3, b3)
    return y


def init_params(key, modality_nums=2, feature_dims=40, hidden_dims=32, num_classes=4):
    """'concat' fusion: fc1 in = NUMS * FEATURE_DIMS; fc2 HIDDEN->HIDDEN; fc3 HIDDEN->C."""
    in_features = modality_nums * feature_dims
    k1, k2, k3, k4, k5, k6 = jax.random.split(key, 6)

    def u(k, shape, fan_in):
        bound = 1.0 / jnp.sqrt(jnp.float32(fan_in))
        return jax.random.uniform(k, shape, jnp.float32, -bound, bound)

    return {
        "w1": u(k1, (in_features, hidden_dims), in_features),
        "b1": u(k2, (1, hidden_dims), in_features),
        "w2": u(k3, (hidden_dims, hidden_dims), hidden_dims),
        "b2": u(k4, (1, hidden_dims), hidden_dims),
        "w3": u(k5, (hidden_dims, num_classes), hidden_dims),
        "b3": u(k6, (1, num_classes), hidden_dims),
    }


def _reference(x, p):
    h1 = jnp.tanh(x @ p["w1"] + p["b1"])
    h2 = jnp.tanh(h1 @ p["w2"] + p["b2"])
    y = h2 @ p["w3"] + p["b3"]
    return y, h2


if __name__ == "__main__":
    key = jax.random.PRNGKey(0)
    kx1, kx2, kp = jax.random.split(key, 3)

    MODALITY_NUMS = 2      # cfg.MODALITY.NUMS
    FEATURE_DIMS = 40      # cfg.FUSION_HEAD.FEATURE_DIMS
    HIDDEN_DIMS = 32       # cfg.FUSION_HEAD.HIDDEN_DIMS
    NUM_CLASSES = 4        # cfg.MODEL.NUM_CLASSES
    BATCH = 8

    params = init_params(kp, MODALITY_NUMS, FEATURE_DIMS, HIDDEN_DIMS, NUM_CLASSES)

    # 1) hid_feature=True, single batch tile.
    x = jax.random.normal(kx1, (BATCH, MODALITY_NUMS * FEATURE_DIMS), jnp.float32)
    y, h = early_fusion(x, params, hid_feature=True)
    y = jax.block_until_ready(y)
    h = jax.block_until_ready(h)
    y_ref, h_ref = _reference(x, params)
    # bf16 inputs/weights/outputs with f32 MXU accumulation -> ~1e-2 level deviation.
    assert y.shape == (BATCH, NUM_CLASSES) and h.shape == (BATCH, HIDDEN_DIMS)
    assert jnp.allclose(y.astype(jnp.float32), y_ref, atol=3e-2, rtol=3e-2), "logits mismatch"
    assert jnp.allclose(h.astype(jnp.float32), h_ref, atol=3e-2, rtol=3e-2), "hidden feature mismatch"

    # 2) hid_feature=False path + multi-step grid with a ragged final batch tile.
    x2 = jax.random.normal(kx2, (20, MODALITY_NUMS * FEATURE_DIMS), jnp.float32)
    y2 = jax.block_until_ready(
        early_fusion(x2, params, hid_feature=False, tile_batch=16))
    y2_ref, _ = _reference(x2, params)
    assert y2.shape == (20, NUM_CLASSES)
    assert jnp.allclose(y2.astype(jnp.float32), y2_ref, atol=3e-2, rtol=3e-2), "y-only path mismatch"

    # 3) f32-output / f32-tanh fallback path still works (v5e-style configuration).
    y3 = jax.block_until_ready(
        early_fusion(x2, params, hid_feature=False,
                     out_dtype=jnp.float32, bf16_tanh=False))
    assert jnp.allclose(y3, y2_ref, atol=2e-2, rtol=2e-2), "f32-output path mismatch"

    print("KERNEL_OK")
</pallas_src>

<mosaic_0001>
module attributes {stable_mosaic.version = 11 : i64} {
  func.func @kernel_y_and_h(%arg0: i32, %arg1: memref<8x80xf32, #tpu.memory_space<vmem>>, %arg2: memref<80x32xbf16, #tpu.memory_space<vmem>>, %arg3: memref<1x32xf32, #tpu.memory_space<vmem>>, %arg4: memref<32x32xbf16, #tpu.memory_space<vmem>>, %arg5: memref<1x32xf32, #tpu.memory_space<vmem>>, %arg6: memref<32x4xbf16, #tpu.memory_space<vmem>>, %arg7: memref<1x4xf32, #tpu.memory_space<vmem>>, %arg8: memref<8x4xbf16, #tpu.memory_space<vmem>>, %arg9: memref<8x32xbf16, #tpu.memory_space<vmem>>) attributes {dimension_semantics = [#tpu.dimension_semantics<parallel>], iteration_bounds = array<i64: 1>, scalar_prefetch = 0 : i64, scratch_operands = 0 : i64, tpu.core_type = #tpu.core_type<tc>, window_params = [{transform_indices = @transform_0, window_bounds = array<i64: 8, 80>}, {pipeline_mode = #tpu.pipeline_mode<synchronous>, transform_indices = @transform_1, window_bounds = array<i64: 80, 32>}, {pipeline_mode = #tpu.pipeline_mode<synchronous>, transform_indices = @transform_2, window_bounds = array<i64: 1, 32>}, {pipeline_mode = #tpu.pipeline_mode<synchronous>, transform_indices = @transform_3, window_bounds = array<i64: 32, 32>}, {pipeline_mode = #tpu.pipeline_mode<synchronous>, transform_indices = @transform_4, window_bounds = array<i64: 1, 32>}, {pipeline_mode = #tpu.pipeline_mode<synchronous>, transform_indices = @transform_5, window_bounds = array<i64: 32, 4>}, {pipeline_mode = #tpu.pipeline_mode<synchronous>, transform_indices = @transform_6, window_bounds = array<i64: 1, 4>}, {transform_indices = @transform_7, window_bounds = array<i64: 8, 4>}, {transform_indices = @transform_8, window_bounds = array<i64: 8, 32>}]} {
    %c0 = arith.constant 0 : index
    %c0_0 = arith.constant 0 : index
    %0 = vector.load %arg1[%c0, %c0_0] : memref<8x80xf32, #tpu.memory_space<vmem>>, vector<8x80xf32>
    %1 = arith.truncf %0 : vector<8x80xf32> to vector<8x80xbf16>
    %c0_1 = arith.constant 0 : index
    %c0_2 = arith.constant 0 : index
    %2 = vector.load %arg2[%c0_1, %c0_2] : memref<80x32xbf16, #tpu.memory_space<vmem>>, vector<80x32xbf16>
    %cst = arith.constant dense<0.000000e+00> : vector<8x32xf32>
    %3 = tpu.matmul %1, %2, %cst {dimension_numbers = #tpu.dot_dimension_numbers<[1], [0], [0], [1], [0, 0, 1, 1], [], []>} : vector<8x80xbf16>, vector<80x32xbf16>, vector<8x32xf32> -> vector<8x32xf32>
    %c0_3 = arith.constant 0 : index
    %c0_4 = arith.constant 0 : index
    %4 = vector.load %arg3[%c0_3, %c0_4] : memref<1x32xf32, #tpu.memory_space<vmem>>, vector<1x32xf32>
    %5 = vector.broadcast %4 : vector<1x32xf32> to vector<8x32xf32>
    %6 = arith.addf %3, %5 : vector<8x32xf32>
    %7 = arith.truncf %6 : vector<8x32xf32> to vector<8x32xbf16>
    %8 = math.tanh %7 : vector<8x32xbf16>
    %c0_5 = arith.constant 0 : index
    %c0_6 = arith.constant 0 : index
    %9 = vector.load %arg4[%c0_5, %c0_6] : memref<32x32xbf16, #tpu.memory_space<vmem>>, vector<32x32xbf16>
    %cst_7 = arith.constant dense<0.000000e+00> : vector<8x32xf32>
    %10 = tpu.matmul %8, %9, %cst_7 {dimension_numbers = #tpu.dot_dimension_numbers<[1], [0], [0], [1], [0, 0, 1, 1], [], []>} : vector<8x32xbf16>, vector<32x32xbf16>, vector<8x32xf32> -> vector<8x32xf32>
    %c0_8 = arith.constant 0 : index
    %c0_9 = arith.constant 0 : index
    %11 = vector.load %arg5[%c0_8, %c0_9] : memref<1x32xf32, #tpu.memory_space<vmem>>, vector<1x32xf32>
    %12 = vector.broadcast %11 : vector<1x32xf32> to vector<8x32xf32>
    %13 = arith.addf %10, %12 : vector<8x32xf32>
    %14 = arith.truncf %13 : vector<8x32xf32> to vector<8x32xbf16>
    %15 = math.tanh %14 : vector<8x32xbf16>
    %c0_10 = arith.constant 0 : index
    %c0_11 = arith.constant 0 : index
    %16 = vector.load %arg6[%c0_10, %c0_11] : memref<32x4xbf16, #tpu.memory_space<vmem>>, vector<32x4xbf16>
    %cst_12 = arith.constant dense<0.000000e+00> : vector<8x4xf32>
    %17 = tpu.matmul %15, %16, %cst_12 {dimension_numbers = #tpu.dot_dimension_numbers<[1], [0], [0], [1], [0, 0, 1, 1], [], []>} : vector<8x32xbf16>, vector<32x4xbf16>, vector<8x4xf32> -> vector<8x4xf32>
    %c0_13 = arith.constant 0 : index
    %c0_14 = arith.constant 0 : index
    %18 = vector.load %arg7[%c0_13, %c0_14] : memref<1x4xf32, #tpu.memory_space<vmem>>, vector<1x4xf32>
    %19 = vector.broadcast %18 : vector<1x4xf32> to vector<8x4xf32>
    %20 = arith.addf %17, %19 : vector<8x4xf32>
    %21 = arith.truncf %20 : vector<8x4xf32> to vector<8x4xbf16>
    %c0_15 = arith.constant 0 : index
    %c0_16 = arith.constant 0 : index
    %22 = vector.load %arg8[%c0_15, %c0_16] : memref<8x4xbf16, #tpu.memory_space<vmem>>, vector<8x4xbf16>
    tpu.vector_store %arg8[%c0_15, %c0_16], %21 {strides = array<i32>} : memref<8x4xbf16, #tpu.memory_space<vmem>>, vector<8x4xbf16>,
    %c0_17 = arith.constant 0 : index
    %c0_18 = arith.constant 0 : index
    %23 = vector.load %arg9[%c0_17, %c0_18] : memref<8x32xbf16, #tpu.memory_space<vmem>>, vector<8x32xbf16>
    tpu.vector_store %arg9[%c0_17, %c0_18], %15 {strides = array<i32>} : memref<8x32xbf16, #tpu.memory_space<vmem>>, vector<8x32xbf16>,
    return
  }
  func.func @transform_0(%arg0: i32) -> (i32, i32) {
    %c0_i32 = arith.constant 0 : i32
    %c0_i32_0 = arith.constant 0 : i32
    return %arg0, %c0_i32 : i32, i32
  }
  func.func @transform_1(%arg0: i32) -> (i32, i32) {
    %c0_i32 = arith.constant 0 : i32
    %c0_i32_0 = arith.constant 0 : i32
    %c0_i32_1 = arith.constant 0 : i32
    return %c0_i32, %c0_i32_0 : i32, i32
  }
  func.func @transform_2(%arg0: i32) -> (i32, i32) {
    %c0_i32 = arith.constant 0 : i32
    %c0_i32_0 = arith.constant 0 : i32
    %c0_i32_1 = arith.constant 0 : i32
    return %c0_i32, %c0_i32_0 : i32, i32
  }
  func.func @transform_3(%arg0: i32) -> (i32, i32) {
    %c0_i32 = arith.constant 0 : i32
    %c0_i32_0 = arith.constant 0 : i32
    %c0_i32_1 = arith.constant 0 : i32
    return %c0_i32, %c0_i32_0 : i32, i32
  }
  func.func @transform_4(%arg0: i32) -> (i32, i32) {
    %c0_i32 = arith.constant 0 : i32
    %c0_i32_0 = arith.constant 0 : i32
    %c0_i32_1 = arith.constant 0 : i32
    return %c0_i32, %c0_i32_0 : i32, i32
  }
  func.func @transform_5(%arg0: i32) -> (i32, i32) {
    %c0_i32 = arith.constant 0 : i32
    %c0_i32_0 = arith.constant 0 : i32
    %c0_i32_1 = arith.constant 0 : i32
    return %c0_i32, %c0_i32_0 : i32, i32
  }
  func.func @transform_6(%arg0: i32) -> (i32, i32) {
    %c0_i32 = arith.constant 0 : i32
    %c0_i32_0 = arith.constant 0 : i32
    %c0_i32_1 = arith.constant 0 : i32
    return %c0_i32, %c0_i32_0 : i32, i32
  }
  func.func @transform_7(%arg0: i32) -> (i32, i32) {
    %c0_i32 = arith.constant 0 : i32
    %c0_i32_0 = arith.constant 0 : i32
    return %arg0, %c0_i32 : i32, i32
  }
  func.func @transform_8(%arg0: i32) -> (i32, i32) {
    %c0_i32 = arith.constant 0 : i32
    %c0_i32_0 = arith.constant 0 : i32
    return %arg0, %c0_i32 : i32, i32
  }
}

</mosaic_0001>

<bundles_post_ra>
// kernel: tpu_custom_call.1
= control target key start
LH: loop header
LB: loop body
LE: loop exit
PB: predicated region body
PF: predicated region fallthrough
CT: control target
= control target key end

     0   :  { %14 = vsyncpa [#allocation3], 0  ;;  %s858_s0 = inlined_call_operand.hbm [shape: f32[8,80], index: 0, kind: input, shape index: {}]   ;;  %s859_s1 = inlined_call_operand.hbm [shape: bf16[80,32], index: 1, kind: input, shape index: {}]   ;;  %s860_s2 = inlined_call_operand.hbm [shape: f32[1,32], index: 2, kind: input, shape index: {}]   ;;  %s861_s3 = inlined_call_operand.hbm [shape: bf16[32,32], index: 3, kind: input, shape index: {}]   ;;  %s862_s4 = inlined_call_operand.hbm [shape: f32[1,32], index: 4, kind: input, shape index: {}]   ;;  %s863_s5 = inlined_call_operand.hbm [shape: bf16[32,4], index: 5, kind: input, shape index: {}]   ;;  %s864_s6 = inlined_call_operand.hbm [shape: f32[1,4], index: 6, kind: input, shape index: {}]   ;;  %s865_s7 = inlined_call_operand.hbm [shape: bf16[8,4], index: 7, kind: output, shape index: {0}]   ;;  %s866_s8 = inlined_call_operand.hbm [shape: bf16[8,32], index: 8, kind: output, shape index: {1}]  }
   0x1   :  { %15 = vsyncpa [#allocation6], 0 }
   0x2   :  { %16 = vsyncpa [#allocation9], 0 }
   0x3   :  { %17 = vsyncpa [#allocation12], 0 }
   0x4   :  { %18 = vsyncpa [#allocation4], 0 }
   0x5   :  { %19 = vsyncpa [#allocation16], 0  ;;  %s678_s27 = smov [#allocation5]   ;;  %s468_s9 = scalar_lea.hbm %s859_s1, 640 }
   0x6   :  { %s35_s28 = sshll.u32 %s678_s27, 4  ;;  %p469_p0 = scmp.ne.s32.totalorder %s859_s1, %s468_s9  ;;  %s36_s28 = int_to_ptr.vmem [resolvable:$true] %s35_s28 }
   0x7   :  { %p472_p1 = scmp.lt.u32.totalorder %s468_s9, %s859_s1 }
   0x9   :  { %p474_p2 = pnand %p472_p1, %p469_p0 }
   0xb   :  { %477 = shalt.err (!%p474_p2)
}
   0xc   :  { %s478_s14 = scalar_lea.vmem %s36_s28, 640  ;;  %p483_p4 = scmp.lt.s32.totalorder %s36_s28, %s36_s28 }
   0xd   :  { %p479_p3 = scmp.ne.s32.totalorder %s36_s28, %s478_s14  ;;  %p484_p5 = scmp.lt.s32.totalorder %s478_s14, %s478_s14 }
   0xf   :  { %p485_p6 = por %p484_p5, %p483_p4 }
  0x11   :  { %p486_p7 = pnand %p485_p6, %p479_p3 }
  0x13   :  { %489 = shalt.err (!%p486_p7)
}
  0x14   :  { %s679_s15 = smov 64   ;;  %s680_s16 = smov 4  }
  0x15   :  { %41 = dma.hbm_to_vmem [thread:$0]  %s859_s1, 640, %s36_s28, [#allocation6], %s679_s15, %s679_s15, %s680_s16  }
  0x16   :  { %s681_s19 = smov [#allocation8]   ;;  %s682_s21 = smov [#allocation11]  }
  0x17   :  { %s57_s20 = sshll.u32 %s681_s19, 4  ;;  %s79_s22 = sshll.u32 %s682_s21, 4  ;;  %s58_s20 = int_to_ptr.vmem [resolvable:$true] %s57_s20  ;;  %s80_s22 = int_to_ptr.vmem [resolvable:$true] %s79_s22 }
  0x18   :  { %s490_s25 = scalar_lea.hbm %s861_s3, 256 }
  0x19   :  { %p491_p8 = scmp.ne.s32.totalorder %s861_s3, %s490_s25  ;;  %p494_p9 = scmp.lt.u32.totalorder %s490_s25, %s861_s3 }
  0x1b   :  { %p496_p10 = pnand %p494_p9, %p491_p8 }
  0x1d   :  { %499 = shalt.err (!%p496_p10)
}
  0x1e   :  { %s500_s1 = scalar_lea.vmem %s58_s20, 256  ;;  %p505_p12 = scmp.lt.s32.totalorder %s58_s20, %s58_s20 }
  0x1f   :  { %p501_p11 = scmp.ne.s32.totalorder %s58_s20, %s500_s1  ;;  %p506_p13 = scmp.lt.s32.totalorder %s500_s1, %s500_s1 }
  0x21   :  { %p507_p0 = por %p506_p13, %p505_p12 }
  0x23   :  { %p508_p1 = pnand %p507_p0, %p501_p11 }
  0x25   :  { %511 = shalt.err (!%p508_p1)
}
  0x26   :  { %63 = dma.hbm_to_vmem [thread:$0]  %s861_s3, 256, %s58_s20, [#allocation9], %s679_s15, %s679_s15, %s680_s16  }
  0x27   :  { %s512_s12 = scalar_lea.hbm %s863_s5, 256 }
  0x28   :  { %p513_p2 = scmp.ne.s32.totalorder %s863_s5, %s512_s12  ;;  %p516_p3 = scmp.lt.u32.totalorder %s512_s12, %s863_s5 }
  0x2a   :  { %p518_p4 = pnand %p516_p3, %p513_p2 }
  0x2c   :  { %521 = shalt.err (!%p518_p4)
}
  0x2d   :  { %s522_s19 = scalar_lea.vmem %s80_s22, 256  ;;  %p527_p6 = scmp.lt.s32.totalorder %s80_s22, %s80_s22 }
  0x2e   :  { %p523_p5 = scmp.ne.s32.totalorder %s80_s22, %s522_s19  ;;  %p528_p7 = scmp.lt.s32.totalorder %s522_s19, %s522_s19 }
  0x30   :  { %p529_p8 = por %p528_p7, %p527_p6 }
  0x32   :  { %p530_p9 = pnand %p529_p8, %p523_p5 }
  0x34   :  { %533 = shalt.err (!%p530_p9)
}
  0x35   :  { %85 = dma.hbm_to_vmem [thread:$0]  %s863_s5, 256, %s80_s22, [#allocation12], %s679_s15, %s679_s15, %s680_s16  }
  0x36   :  { %s683_s21 = smov [#allocation2]   ;;  %s684_s24 = smov [#allocation7]  }
  0x37   :  { %s26_s23 = sshll.u32 %s683_s21, 4  ;;  %s48_s25 = sshll.u32 %s684_s24, 4  ;;  %s27_s23 = int_to_ptr.vmem [resolvable:$true] %s26_s23  ;;  %s49_s25 = int_to_ptr.vmem [resolvable:$true] %s48_s25 }
  0x38   :  { %s534_s29 = scalar_lea.hbm %s858_s0, 128 }
  0x39   :  { %p535_p10 = scmp.ne.s32.totalorder %s858_s0, %s534_s29  ;;  %p538_p11 = scmp.lt.u32.totalorder %s534_s29, %s858_s0 }
  0x3b   :  { %p540_p12 = pnand %p538_p11, %p535_p10 }
  0x3d   :  { %543 = shalt.err (!%p540_p12)
}
  0x3e   :  { %s544_s5 = scalar_lea.vmem %s27_s23, 128  ;;  %p549_p0 = scmp.lt.s32.totalorder %s27_s23, %s27_s23 }
  0x3f   :  { %p545_p13 = scmp.ne.s32.totalorder %s27_s23, %s544_s5  ;;  %p550_p1 = scmp.lt.s32.totalorder %s544_s5, %s544_s5 }
  0x41   :  { %p551_p2 = por %p550_p1, %p549_p0 }
  0x43   :  { %p552_p3 = pnand %p551_p2, %p545_p13 }
  0x45   :  { %555 = shalt.err (!%p552_p3)
}
  0x46   :  { %29 = dma.hbm_to_vmem [thread:$0]  %s858_s0, 128, %s27_s23, [#allocation3]  }
  0x47   :  { %s556_s11 = scalar_lea.hbm %s860_s2, 16 }
  0x48   :  { %p557_p4 = scmp.ne.s32.totalorder %s860_s2, %s556_s11  ;;  %p560_p5 = scmp.lt.u32.totalorder %s556_s11, %s860_s2 }
  0x4a   :  { %p562_p6 = pnand %p560_p5, %p557_p4 }
  0x4c   :  { %565 = shalt.err (!%p562_p6)
}
  0x4d   :  { %s566_s18 = scalar_lea.vmem %s49_s25, 16  ;;  %s570_s19 = scalar_lea.vmem %s49_s25, 32 }
  0x4e   :  { %p567_p7 = scmp.ne.s32.totalorder %s49_s25, %s566_s18  ;;  %p571_p8 = scmp.lt.s32.totalorder %s49_s25, %s49_s25 }
  0x4f   :  { %p572_p9 = scmp.lt.s32.totalorder %s570_s19, %s566_s18 }
  0x51   :  { %p573_p10 = por %p572_p9, %p571_p8 }
  0x53   :  { %p574_p11 = pnand %p573_p10, %p567_p7 }
  0x55   :  { %577 = shalt.err (!%p574_p11)
}
  0x56   :  { %51 = dma.hbm_to_vmem [thread:$0]  %s860_s2, 16, %s49_s25, [#allocation6]  }
  0x57   :  { %s685_s20 = smov [#allocation10]   ;;  %s686_s23 = smov [#allocation13]  }
  0x58   :  { %s70_s21 = sshll.u32 %s685_s20, 4  ;;  %s92_s24 = sshll.u32 %s686_s23, 4  ;;  %s71_s21 = int_to_ptr.vmem [resolvable:$true] %s70_s21  ;;  %s93_s24 = int_to_ptr.vmem [resolvable:$true] %s92_s24 }
  0x59   :  { %s578_s29 = scalar_lea.hbm %s862_s4, 16 }
  0x5a   :  { %p579_p12 = scmp.ne.s32.totalorder %s862_s4, %s578_s29  ;;  %p582_p13 = scmp.lt.u32.totalorder %s578_s29, %s862_s4 }
  0x5c   :  { %p584_p0 = pnand %p582_p13, %p579_p12 }
  0x5e   :  { %587 = shalt.err (!%p584_p0)
}
  0x5f   :  { %s588_s2 = scalar_lea.vmem %s71_s21, 16  ;;  %s592_s25 = scalar_lea.vmem %s71_s21, 32 }
  0x60   :  { %p589_p1 = scmp.ne.s32.totalorder %s71_s21, %s588_s2  ;;  %p593_p2 = scmp.lt.s32.totalorder %s71_s21, %s71_s21 }
  0x61   :  { %p594_p3 = scmp.lt.s32.totalorder %s592_s25, %s588_s2 }
  0x63   :  { %p595_p4 = por %p594_p3, %p593_p2 }
  0x65   :  { %p596_p5 = pnand %p595_p4, %p589_p1 }
  0x67   :  { %599 = shalt.err (!%p596_p5)
}
  0x68   :  { %73 = dma.hbm_to_vmem [thread:$0]  %s862_s4, 16, %s71_s21, [#allocation9]  }
  0x69   :  { %s600_s10 = scalar_lea.hbm %s864_s6, 16 }
  0x6a   :  { %p601_p6 = scmp.ne.s32.totalorder %s864_s6, %s600_s10  ;;  %p604_p7 = scmp.lt.u32.totalorder %s600_s10, %s864_s6 }
  0x6c   :  { %p606_p8 = pnand %p604_p7, %p601_p6 }
  0x6e   :  { %609 = shalt.err (!%p606_p8)
}
  0x6f   :  { %s610_s17 = scalar_lea.vmem %s93_s24, 16  ;;  %s614_s18 = scalar_lea.vmem %s93_s24, 32 }
  0x70   :  { %p611_p9 = scmp.ne.s32.totalorder %s93_s24, %s610_s17  ;;  %p615_p10 = scmp.lt.s32.totalorder %s93_s24, %s93_s24 }
  0x71   :  { %p616_p11 = scmp.lt.s32.totalorder %s614_s18, %s610_s17 }
  0x73   :  { %p617_p12 = por %p616_p11, %p615_p10 }
  0x75   :  { %p618_p13 = pnand %p617_p12, %p611_p9 }
  0x77   :  { %621 = shalt.err (!%p618_p13)
}
  0x78   :  { %95 = dma.hbm_to_vmem [thread:$0]  %s864_s6, 16, %s93_s24, [#allocation12]  }
  0x79   :  { %666 = dma.done.wait [#allocation3], 128  }
  0x7a   :  { %667 = vsyncadd [#allocation3], 4294967168 }
  0x7b   :  { %668 = dma.done.wait [#allocation6], 656  }
  0x7c   :  { %669 = vsyncadd [#allocation6], 4294966640 }
  0x7d   :  { %670 = dma.done.wait [#allocation9], 272  }
  0x7e   :  { %671 = vsyncadd [#allocation9], 4294967024 }
  0x7f   :  { %672 = dma.done.wait [#allocation12], 272  }
  0x80   :  { %673 = vsyncadd [#allocation12], 4294967024  ;;  %v687_v0 = vmov 0.0   ;;  %vm688_vm0 = vmmov 0   ;;  %v455_v1 = vld [vmem:[#allocation5] sm:$0xff]   ;;  %v456_v2 = vld [vmem:[#allocation5 + $0x8] sm:$0xff]  }
  0x81   :  { %412 = vmatprep.subr.bf16.mxu0 %v687_v0  ;;  %422 = vmatprep.mubr.msk.bf16.mxu0 %vm688_vm0, %v687_v0  ;;  %v457_v3 = vld [vmem:[#allocation5 + $0x10] sm:$0xff]   ;;  %v458_v4 = vld [vmem:[#allocation5 + $0x18] sm:$0xff]   ;;  %v459_v5 = vld [vmem:[#allocation5 + $0x20] sm:$0xff]   ;;  %vm167_vm1 = vcmask 654336   ;;  %vm236_vm2 = vcmask 261120   ;;  %vm351_vm3 = vcmask 257024  }
  0x82   :  { %426 = vmatprep.subr.bf16.mxu1 %v687_v0  ;;  %430 = vmatprep.mubr.msk.bf16.mxu1 %vm688_vm0, %v687_v0  ;;  %v118_v6 = vld [vmem:[#allocation2] sm:$0xff]  ;;  %v460_v8 = vld [vmem:[#allocation8] sm:$0xff]   ;;  %v385_v10 = vld [vmem:[#allocation7] ss:$0 sm:$0xff]  ;;  %s689_s6 = smov [#allocation15]  }
  0x83   :  { %413 = vmatpush3.bf16.msra.mxu0 %v455_v1  ;;  %v119_v7 = vpack.c.bf16 %v118_v6, %v118_v6  ;;  %427 = vmatpush3.bf16.msra.mxu1 %v460_v8  ;;  %v461_v9 = vld [vmem:[#allocation8 + $0x8] sm:$0xff]   ;;  %v462_v18 = vld [vmem:[#allocation11] sm:$0xff]   ;;  %v463_v19 = vld [vmem:[#allocation11 + $0x8] sm:$0xff]   ;;  %s369_s0 = sshll.u32 %s689_s6, 4  ;;  %s370_s0 = int_to_ptr.vmem [resolvable:$true] %s369_s0 }
  0x84   :  { %414 = vmatprep.subr.bf16.mxu0 %v687_v0  ;;  %428 = vmatprep.subr.bf16.mxu1 %v687_v0  ;;  %v392_v20 = vld [vmem:[#allocation10] ss:$0 sm:$0xff]  ;;  %s622_s3 = scalar_lea.vmem %s370_s0, 64  ;;  %p627_p1 = scmp.lt.s32.totalorder %s370_s0, %s370_s0 }
  0x85   :  { %p623_p0 = scmp.ne.s32.totalorder %s370_s0, %s622_s3  ;;  %p628_p2 = scmp.lt.s32.totalorder %s622_s3, %s622_s3 }
  0x87   :  { %415 = vmatpush3.bf16.msra.mxu0 %v456_v2  ;;  %429 = vmatpush3.bf16.msra.mxu1 %v461_v9  ;;  %p629_p3 = por %p628_p2, %p627_p1 }
  0x88   :  { %416 = vmatprep.subr.bf16.mxu0 %v687_v0  ;;  %434 = vmatprep.subr.bf16.mxu1 %v687_v0 }
  0x89   :  { %p630_p4 = pnand %p629_p3, %p623_p0 }
  0x8b   :  { %417 = vmatpush3.bf16.msra.mxu0 %v457_v3 }
  0x8c   :  { %418 = vmatprep.subr.bf16.mxu0 %v687_v0 }
  0x8f   :  { %419 = vmatpush3.bf16.msra.mxu0 %v458_v4 }
  0x90   :  { %420 = vmatprep.subr.bf16.mxu0 %v687_v0 }
  0x93   :  { %421 = vmatpush3.bf16.msra.mxu0 %v459_v5 }
  0x96   :  { %423 = vmatmul.mubr.msk.bf16.vlgmr.msra.gmra.mrb[0].mxu0 %vm167_vm1, %v119_v7 }
 0x169   :  { %v205_v11 = vpop.f32.mrb[0].mxu0 }
 0x16a   :  { %v206_v12 = vadd.f32 %v385_v10, %v205_v11  ;;  %v424_v13 = vpop.f32.mrb[1].mxu0 }
 0x16b   :  { %v208_v14 = vpop.f32.mrb[2].mxu0 }
 0x16c   :  { %v211_v15 = vpack.c.bf16 %v206_v12, %v206_v12  ;;  %v425_v16 = vpop.f32.mrb[3].mxu0 }
 0x16e   :  { %464 = vtanh.bf16 %v211_v15 }
 0x179   :  { %v465_v17 = vpop.eup %464 }
 0x17a   :  { %431 = vmatmul.mubr.msk.bf16.vlgmr.msra.gmra.mrb[0].mxu1 %vm236_vm2, %v465_v17 }
 0x17b   :  { %438 = vmatprep.mubr.msk.bf16.mxu1 %vm688_vm0, %v687_v0  ;;  %435 = vmatpush3.bf16.msra.mxu1 %v462_v18 }
 0x17c   :  { %436 = vmatprep.subr.bf16.mxu1 %v687_v0 }
 0x17f   :  { %437 = vmatpush3.bf16.msra.mxu1 %v463_v19 }
 0x24d   :  { %v274_v21 = vpop.f32.mrb[0].mxu1 }
 0x24e   :  { %v275_v22 = vadd.f32 %v392_v20, %v274_v21  ;;  %v432_v23 = vpop.f32.mrb[1].mxu1 }
 0x24f   :  { %v277_v24 = vpop.f32.mrb[2].mxu1 }
 0x250   :  { %v280_v25 = vpack.c.bf16 %v275_v22, %v275_v22  ;;  %v433_v26 = vpop.f32.mrb[3].mxu1 }
 0x252   :  { %466 = vtanh.bf16 %v280_v25 }
 0x25d   :  { %v467_v27 = vpop.eup %466 }
 0x25e   :  { %439 = vmatmul.mubr.msk.bf16.vlgmr.msra.gmra.mrb[4].mxu1 %vm236_vm2, %v467_v27  ;;  %352 = vst.msk [vmem:[#allocation15] sm:$0xf] %vm351_vm3, %v467_v27 }
 0x25f   :  { %633 = shalt.err (!%p630_p4)
}
 0x260   :  { %s634_s23 = scalar_lea.hbm %s866_s8, 64 }
 0x261   :  { %p635_p5 = scmp.ne.s32.totalorder %s866_s8, %s634_s23  ;;  %p638_p6 = scmp.lt.u32.totalorder %s634_s23, %s866_s8 }
 0x263   :  { %p640_p7 = pnand %p638_p6, %p635_p5 }
 0x265   :  { %643 = shalt.err (!%p640_p7)
}
 0x266   :  { %372 = dma.vmem_to_hbm [thread:$0]  %s370_s0, 64, %s866_s8, [#allocation16]   ;;  %v396_v28 = vld [vmem:[#allocation13] ss:$0 sm:$0xff]  ;;  %vm349_vm4 = vcmask 27648  }
 0x267   :  { %s690_s28 = smov [#allocation14]  }
 0x268   :  { %s359_s9 = sshll.u32 %s690_s28, 4  ;;  %s360_s9 = int_to_ptr.vmem [resolvable:$true] %s359_s9 }
 0x269   :  { %s644_s2 = scalar_lea.vmem %s360_s9, 64  ;;  %p649_p9 = scmp.lt.s32.totalorder %s360_s9, %s360_s9 }
 0x26a   :  { %p645_p8 = scmp.ne.s32.totalorder %s360_s9, %s644_s2  ;;  %p650_p10 = scmp.lt.s32.totalorder %s644_s2, %s644_s2 }
 0x26c   :  { %p651_p11 = por %p650_p10, %p649_p9 }
 0x26e   :  { %p652_p12 = pnand %p651_p11, %p645_p8 }
 0x331   :  { %v342_v29 = vpop.f32.mrb[4].mxu1 }
 0x332   :  { %v343_v30 = vadd.f32 %v396_v28, %v342_v29  ;;  %v440_v31 = vpop.f32.mrb[5].mxu1 }
 0x333   :  { %v345_v32 = vpop.f32.mrb[6].mxu1 }
 0x334   :  { %v348_v33 = vpack.c.bf16 %v343_v30, %v343_v30  ;;  %v441_v34 = vpop.f32.mrb[7].mxu1 }
 0x336   :  { %350 = vst.msk [vmem:[#allocation14] sm:$0xf] %vm349_vm4, %v348_v33 }
 0x337   :  { %655 = shalt.err (!%p652_p12)
}
 0x338   :  { %s656_s5 = scalar_lea.hbm %s865_s7, 64 }
 0x339   :  { %p657_p13 = scmp.ne.s32.totalorder %s865_s7, %s656_s5  ;;  %p660_p0 = scmp.lt.u32.totalorder %s656_s5, %s865_s7 }
 0x33b   :  { %p662_p1 = pnand %p660_p0, %p657_p13 }
 0x33d   :  { %665 = shalt.err (!%p662_p1)
}
 0x33e   :  { %362 = dma.vmem_to_hbm [thread:$0]  %s360_s9, 64, %s865_s7, [#allocation4]  }
 0x33f   :  { %674 = dma.done.wait [#allocation4], 64  }
 0x340   :  { %675 = vsyncadd [#allocation4], 4294967232 }
 0x341   :  { %676 = dma.done.wait [#allocation16], 64  }
 0x342   :  { %677 = vsyncadd [#allocation16], 4294967232 }
 0x343   :  { %379 = vsyncpa [#allocation3], 1 }
 0x344   :  { %380 = vsyncpa [#allocation6], 1 }
 0x345   :  { %381 = vsyncpa [#allocation9], 1 }
 0x346   :  { %382 = vsyncpa [#allocation12], 1 }
 0x347   :  { %383 = vsyncpa [#allocation4], 1 }
 0x348   :  { %384 = vsyncpa [#allocation16], 1 }

</bundles_post_ra>
